<compile_context>
chip_gen: v7x
topology: tpu7x:2x2x1
jax: 0.10.0
libtpu: 0.0.40
codegen_flags: <defaults>
</compile_context>

<pallas_src>
import jax
import jax.numpy as jnp
from jax.experimental import pallas as pl
from jax.experimental.pallas import tpu as pltpu

EPS = 1e-5   # nn.BatchNorm2d default eps
LANE = 128
SUB = 16     # bf16 sublane packing granularity


# ---------------- recompute path (no conv intermediate) ----------------

def _stats_kernel(p_ref, w_ref, sum_ref, sq_ref):
    """Pass 1: one MXU matmul per row tile -> per-tile BN partial stats."""
    conv = jnp.dot(p_ref[...], w_ref[...], preferred_element_type=jnp.float32)
    sum_ref[...] = jnp.sum(conv, axis=0, keepdims=True)[None]
    sq_ref[...] = jnp.sum(conv * conv, axis=0, keepdims=True)[None]


def _conv_bn_relu_kernel(p_ref, w_ref, scale_ref, shift_ref, o_ref):
    """Pass 2: y = relu(conv(p, w) * scale + shift), per row tile."""
    conv = jnp.dot(p_ref[...], w_ref[...], preferred_element_type=jnp.float32)
    y = conv * scale_ref[...] + shift_ref[...]
    o_ref[...] = jnp.maximum(y, 0.0).astype(o_ref.dtype)


# ---------------- intermediate path (bf16 conv written once) ----------------

def _conv_stats_kernel(p_ref, w_ref, conv_ref, sum_ref, sq_ref):
    """Pass 1: matmul -> bf16 conv tile + f32 per-tile BN partial stats."""
    conv = jnp.dot(p_ref[...], w_ref[...], preferred_element_type=jnp.float32)
    conv_ref[...] = conv.astype(conv_ref.dtype)
    sum_ref[...] = jnp.sum(conv, axis=0, keepdims=True)[None]
    sq_ref[...] = jnp.sum(conv * conv, axis=0, keepdims=True)[None]


def _bn_relu_kernel(conv_ref, scale_ref, shift_ref, o_ref):
    """Pass 2: y = relu(conv * scale + shift), per row tile."""
    y = conv_ref[...].astype(jnp.float32) * scale_ref[...] + shift_ref[...]
    o_ref[...] = jnp.maximum(y, 0.0).astype(o_ref.dtype)


def conv_relu(x_nchw, weight_oihw, conv_bias, gamma, beta, *, padding=1,
              tile_r=1024):
    """Forward of ConvReLU (training-mode BN). (N,Cin,H,W) -> (N,Cout,H,W).

    conv_bias is accepted for API parity but is not used by the kernels: a
    bias added before training-mode BatchNorm cancels exactly.
    """
    del conv_bias  # cancels exactly under training-mode BatchNorm
    N, Cin, H, W = x_nchw.shape
    Cout, Cin_w, KH, KW = weight_oihw.shape
    assert Cin == Cin_w

    K = KH * KW * Cin
    R = N * H * W
    cout_p = ((Cout + LANE - 1) // LANE) * LANE
    out_dtype = x_nchw.dtype
    out_bytes = jnp.dtype(out_dtype).itemsize

    # Recompute the matmul in pass 2 instead of writing / re-reading an
    # (R, Cout_p) conv intermediate when the patches are the smaller stream.
    recompute = K <= 2 * cout_p
    conv_bytes = 0 if recompute else 2  # bf16 intermediate otherwise

    # ---- tile_r selection: multiple of 16, VMEM-budgeted, megacore-aware ----
    tile_r = max(SUB, (int(tile_r) // SUB) * SUB)
    per_row_p1 = 2 * (K * 2 + cout_p * conv_bytes)
    if recompute:
        per_row_p2 = 2 * (K * 2 + cout_p * out_bytes)
    else:
        per_row_p2 = 2 * (cout_p * 2 + cout_p * out_bytes)
    per_row = max(per_row_p1, per_row_p2, 1)
    fixed = 2 * K * cout_p * 2                 # double-buffered bf16 weights
    budget = 24 * 1024 * 1024                  # headroom on v7x's 64 MiB VMEM
    cap = max(SUB, ((budget - fixed) // per_row) // SUB * SUB)
    tile_r = min(tile_r, cap)
    if tile_r >= R:                            # >=2 tiles so both v7x TCs work
        two = ((pl.cdiv(R, 2) + SUB - 1) // SUB) * SUB
        if two < R:
            tile_r = two
    num_tiles = pl.cdiv(R, tile_r)
    r_pad = num_tiles * tile_r
    vmem_limit = int(min(max(fixed + per_row * tile_r + (2 << 20), 16 << 20),
                         32 << 20))
    cparams = pltpu.CompilerParams(dimension_semantics=("parallel",),
                                   vmem_limit_bytes=vmem_limit)

    # ---- glue: NCHW -> NHWC, pad, im2col tap stacking -> (R_pad, K) bf16 ----
    # TODO(synk): replace materialized im2col with an in-kernel halo-band DMA
    #   or shift-and-accumulate scheme (removes the 9x input-read expansion).
    x = jnp.transpose(x_nchw, (0, 2, 3, 1))
    xp = jnp.pad(x, ((0, 0), (padding, padding), (padding, padding), (0, 0)))
    taps = [xp[:, kh:kh + H, kw:kw + W, :]
            for kh in range(KH) for kw in range(KW)]
    patches = jnp.stack(taps, axis=3).reshape(R, K)     # layout: t*Cin + c
    patches = jnp.pad(patches, ((0, r_pad - R), (0, 0))).astype(jnp.bfloat16)

    # OIHW -> (KH,KW,Cin,Cout) -> (K, Cout_p), matching the tap/channel order.
    w2 = jnp.transpose(weight_oihw, (2, 3, 1, 0)).reshape(K, Cout)
    w2 = jnp.pad(w2, ((0, 0), (0, cout_p - Cout))).astype(jnp.bfloat16)

    p_spec = pl.BlockSpec((tile_r, K), lambda i: (i, 0))
    w_spec = pl.BlockSpec((K, cout_p), lambda i: (0, 0))
    row_spec = pl.BlockSpec((tile_r, cout_p), lambda i: (i, 0))
    vec_spec = pl.BlockSpec((1, cout_p), lambda i: (0, 0))
    stat_spec = pl.BlockSpec((1, 1, cout_p), lambda i: (i, 0, 0))
    stat_shape = jax.ShapeDtypeStruct((num_tiles, 1, cout_p), jnp.float32)

    # ---- Pass 1: MXU matmul + per-tile BN partial sums (tiled, pipelined) ----
    if recompute:
        sums, sumsqs = pl.pallas_call(
            _stats_kernel,
            out_shape=(stat_shape, stat_shape),
            grid=(num_tiles,),
            in_specs=[p_spec, w_spec],
            out_specs=(stat_spec, stat_spec),
            compiler_params=cparams,
        )(patches, w2)
        conv_out = None
    else:
        conv_out, sums, sumsqs = pl.pallas_call(
            _conv_stats_kernel,
            out_shape=(jax.ShapeDtypeStruct((r_pad, cout_p), jnp.bfloat16),
                       stat_shape, stat_shape),
            grid=(num_tiles,),
            in_specs=[p_spec, w_spec],
            out_specs=(row_spec, stat_spec, stat_spec),
            compiler_params=cparams,
        )(patches, w2)

    # ---- Fold training-mode BN batch stats into a per-channel affine ----
    sum_c = jnp.sum(sums[:, 0, :], axis=0)       # (Cout_p,)
    sq_c = jnp.sum(sumsqs[:, 0, :], axis=0)      # (Cout_p,)
    mean = sum_c / R
    var = jnp.maximum(sq_c / R - mean * mean, 0.0)   # biased variance
    g_p = jnp.pad(gamma.astype(jnp.float32), (0, cout_p - Cout),
                  constant_values=1.0)
    b_p = jnp.pad(beta.astype(jnp.float32), (0, cout_p - Cout))
    scale = (g_p * jax.lax.rsqrt(var + EPS)).reshape(1, cout_p)
    shift = (b_p - mean * scale[0]).reshape(1, cout_p)

    # ---- Pass 2: (re)matmul or re-read + affine + ReLU (lane-dense stores) ----
    if recompute:
        out_flat = pl.pallas_call(
            _conv_bn_relu_kernel,
            out_shape=jax.ShapeDtypeStruct((r_pad, cout_p), out_dtype),
            grid=(num_tiles,),
            in_specs=[p_spec, w_spec, vec_spec, vec_spec],
            out_specs=row_spec,
            compiler_params=cparams,
        )(patches, w2, scale, shift)
    else:
        out_flat = pl.pallas_call(
            _bn_relu_kernel,
            out_shape=jax.ShapeDtypeStruct((r_pad, cout_p), out_dtype),
            grid=(num_tiles,),
            in_specs=[row_spec, vec_spec, vec_spec],
            out_specs=row_spec,
            compiler_params=cparams,
        )(conv_out, scale, shift)

    # glue: (R_pad, Cout_p) -> (N, H, W, Cout) -> NCHW
    out = out_flat[:R, :Cout].reshape(N, H, W, Cout)
    return jnp.transpose(out, (0, 3, 1, 2))


if __name__ == "__main__":
    key = jax.random.PRNGKey(0)
    kx, kw, kb, kg, kbt = jax.random.split(key, 5)

    N, Cin, H, W = 2, 4, 16, 16
    Cout, KH, KW = 8, 3, 3

    x = jax.random.normal(kx, (N, Cin, H, W), jnp.float32)
    weight = 0.1 * jax.random.normal(kw, (Cout, Cin, KH, KW), jnp.float32)
    conv_bias = 0.1 * jax.random.normal(kb, (Cout,), jnp.float32)
    gamma = 1.0 + 0.1 * jax.random.normal(kg, (Cout,), jnp.float32)
    beta = 0.1 * jax.random.normal(kbt, (Cout,), jnp.float32)

    out = conv_relu(x, weight, conv_bias, gamma, beta, padding=1)
    out = jax.block_until_ready(out)

    # Pure-JAX f32 reference (conv WITH bias + training-mode BN: the kernel's
    # bias-drop must be exactly invisible in the output).
    conv_ref = jax.lax.conv_general_dilated(
        x, weight, window_strides=(1, 1), padding=((1, 1), (1, 1)),
        dimension_numbers=("NCHW", "OIHW", "NCHW"),
    ) + conv_bias[None, :, None, None]
    m = jnp.mean(conv_ref, axis=(0, 2, 3), keepdims=True)
    v = jnp.mean((conv_ref - m) ** 2, axis=(0, 2, 3), keepdims=True)
    ref = (conv_ref - m) * jax.lax.rsqrt(v + EPS)
    ref = ref * gamma[None, :, None, None] + beta[None, :, None, None]
    ref = jnp.maximum(ref, 0.0)

    assert out.shape == (N, Cout, H, W)
    # Tolerance accounts for bf16 MXU operands (f32 accumulation / BN math).
    max_err = float(jnp.max(jnp.abs(out - ref)))
    assert jnp.allclose(out, ref, atol=2e-2, rtol=2e-2), max_err
    print("KERNEL_OK")
</pallas_src>

<mosaic_0001>
module attributes {stable_mosaic.version = 11 : i64} {
  func.func @_stats_kernel(%arg0: i32, %arg1: memref<256x36xbf16, #tpu.memory_space<vmem>>, %arg2: memref<36x128xbf16, #tpu.memory_space<vmem>>, %arg3: memref<1x1x128xf32, #tpu.memory_space<vmem>>, %arg4: memref<1x1x128xf32, #tpu.memory_space<vmem>>) attributes {dimension_semantics = [#tpu.dimension_semantics<parallel>], iteration_bounds = array<i64: 2>, scalar_prefetch = 0 : i64, scratch_operands = 0 : i64, tpu.core_type = #tpu.core_type<tc>, window_params = [{transform_indices = @transform_0, window_bounds = array<i64: 256, 36>}, {pipeline_mode = #tpu.pipeline_mode<synchronous>, transform_indices = @transform_1, window_bounds = array<i64: 36, 128>}, {transform_indices = @transform_2, window_bounds = array<i64: 1, 1, 128>}, {transform_indices = @transform_3, window_bounds = array<i64: 1, 1, 128>}]} {
    %c0 = arith.constant 0 : index
    %c0_0 = arith.constant 0 : index
    %0 = vector.load %arg1[%c0, %c0_0] : memref<256x36xbf16, #tpu.memory_space<vmem>>, vector<256x36xbf16>
    %c0_1 = arith.constant 0 : index
    %c0_2 = arith.constant 0 : index
    %1 = vector.load %arg2[%c0_1, %c0_2] : memref<36x128xbf16, #tpu.memory_space<vmem>>, vector<36x128xbf16>
    %cst = arith.constant dense<0.000000e+00> : vector<256x128xf32>
    %2 = tpu.matmul %0, %1, %cst {dimension_numbers = #tpu.dot_dimension_numbers<[1], [0], [0], [1], [0, 0, 1, 1], [], []>} : vector<256x36xbf16>, vector<36x128xbf16>, vector<256x128xf32> -> vector<256x128xf32>
    %cst_3 = arith.constant dense<0.000000e+00> : vector<128xf32>
    %3 = vector.multi_reduction <add>, %2, %cst_3 [0] : vector<256x128xf32> to vector<128xf32>
    %4 = vector.shape_cast %3 : vector<128xf32> to vector<1x128xf32>
    %5 = vector.shape_cast %4 : vector<1x128xf32> to vector<1x1x128xf32>
    %c0_4 = arith.constant 0 : index
    %c0_5 = arith.constant 0 : index
    %c0_6 = arith.constant 0 : index
    %6 = vector.load %arg3[%c0_4, %c0_5, %c0_6] : memref<1x1x128xf32, #tpu.memory_space<vmem>>, vector<1x1x128xf32>
    tpu.vector_store %arg3[%c0_4, %c0_5, %c0_6], %5 {strides = array<i32>} : memref<1x1x128xf32, #tpu.memory_space<vmem>>, vector<1x1x128xf32>,
    %7 = arith.mulf %2, %2 : vector<256x128xf32>
    %cst_7 = arith.constant dense<0.000000e+00> : vector<128xf32>
    %8 = vector.multi_reduction <add>, %7, %cst_7 [0] : vector<256x128xf32> to vector<128xf32>
    %9 = vector.shape_cast %8 : vector<128xf32> to vector<1x128xf32>
    %10 = vector.shape_cast %9 : vector<1x128xf32> to vector<1x1x128xf32>
    %c0_8 = arith.constant 0 : index
    %c0_9 = arith.constant 0 : index
    %c0_10 = arith.constant 0 : index
    %11 = vector.load %arg4[%c0_8, %c0_9, %c0_10] : memref<1x1x128xf32, #tpu.memory_space<vmem>>, vector<1x1x128xf32>
    tpu.vector_store %arg4[%c0_8, %c0_9, %c0_10], %10 {strides = array<i32>} : memref<1x1x128xf32, #tpu.memory_space<vmem>>, vector<1x1x128xf32>,
    return
  }
  func.func @transform_0(%arg0: i32) -> (i32, i32) {
    %c0_i32 = arith.constant 0 : i32
    %c0_i32_0 = arith.constant 0 : i32
    return %arg0, %c0_i32 : i32, i32
  }
  func.func @transform_1(%arg0: i32) -> (i32, i32) {
    %c0_i32 = arith.constant 0 : i32
    %c0_i32_0 = arith.constant 0 : i32
    %c0_i32_1 = arith.constant 0 : i32
    return %c0_i32, %c0_i32_0 : i32, i32
  }
  func.func @transform_2(%arg0: i32) -> (i32, i32, i32) {
    %c0_i32 = arith.constant 0 : i32
    %c0_i32_0 = arith.constant 0 : i32
    %c0_i32_1 = arith.constant 0 : i32
    return %arg0, %c0_i32, %c0_i32_0 : i32, i32, i32
  }
  func.func @transform_3(%arg0: i32) -> (i32, i32, i32) {
    %c0_i32 = arith.constant 0 : i32
    %c0_i32_0 = arith.constant 0 : i32
    %c0_i32_1 = arith.constant 0 : i32
    return %arg0, %c0_i32, %c0_i32_0 : i32, i32, i32
  }
}

</mosaic_0001>

<bundles_post_ra>
// kernel: tpu_custom_call.1
= control target key start
LH: loop header
LB: loop body
LE: loop exit
PB: predicated region body
PF: predicated region fallthrough
CT: control target
= control target key end

     0   :  { %9 = vsyncpa [#allocation3], 0  ;;  %s1249_s0 = inlined_call_operand.vmem [shape: bf16[512,36], index: 0, kind: input, shape index: {}]   ;;  %s1250_s1 = inlined_call_operand.vmem [shape: bf16[36,128], index: 1, kind: input, shape index: {}]   ;;  %s1251_s2 = inlined_call_operand.hbm [shape: f32[2,1,128], index: 2, kind: output, shape index: {0}]   ;;  %s1252_s3 = inlined_call_operand.hbm [shape: f32[2,1,128], index: 3, kind: output, shape index: {1}]  }
   0x1   :  { %11 = vsyncpa [#allocation3 + $0x1], 0 }
   0x2   :  { %12 = vsyncpa [#allocation5], 0 }
   0x3   :  { %14 = vsyncpa [#allocation5 + $0x1], 0  ;;  %s1039_s12 = smov 0   ;;  %s1041_s13 = smov 0  }
   0x4   :  { %s1043_s14 = smov 0   ;;  %s1045_s15 = smov 0  }
   0x5 LB: > { %s1060_s16 = sadd.s32 4294967295, %s1015_s15   ;;  %s748_s17 = sadd.s32 4294967294, %s1015_s15   ;;  %s1015_s15 = sphi %s1045_s15, %s1258_s15   ;;  %s1011_s14 = sphi %s1043_s14, %s1257_s14   ;;  %s1007_s13 = sphi %s1041_s13, %s1256_s13   ;;  %s1003_s12 = sphi %s1039_s12, %s1255_s12  }
   0x6   : > { %s1064_s18 = sadd.s32 1, %s1015_s15   ;;  %s74_s19 = sadd.s32 1, %s1011_s14 }
   0x7   : > { %s71_s20 = ssub.s32 %s1015_s15, %s1064_s18  ;;  %p84_p0 = scmp.ne.s32.totalorder %s1011_s14, %s1007_s13 }
   0x8   : > { %p72_p1 = scmp.eq.s32.totalorder %s71_s20, 0  ;;  %p85_p2 = scmp.eq.s32.totalorder %s1060_s16, 1 }
   0x9   : > { %p90_p3 = scmp.ne.s32.totalorder %s1007_s13, %s1003_s12  ;;  %p91_p4 = scmp.eq.s32.totalorder %s748_s17, 1 }
   0xa   : > { %s1075_s21 = scalar_select %p72_p1, %s1011_s14, %s74_s19  }
   0xb   : > { %p1077_p5 = por %p85_p2, %p84_p0  ;;  %p1081_p6 = por %p91_p4, %p90_p3 }
   0xc   : > { %p751_p7 = scmp.ge.s32.totalorder %s1015_s15, 1  ;;  %p147_p8 = scmp.lt.s32.totalorder %s1015_s15, 3 }
   0xe   : > { %p148_p9 = pnand %p751_p7, %p147_p8 }
   0xf   : > { %v902_v0 = vld [vmem:[%s1250_s1] sm:$0xff] (!%p148_p9)   ;;  %v903_v1 = vld [vmem:[%s1250_s1 + $0x8] sm:$0xff] (!%p148_p9)   ;;  %s752_s28 = sshll.u32 (!%p148_p9), %s1060_s16, 5  ;;  %v904_v2 = vld [vmem:[%s1250_s1 + $0x10] ss:$0 sps:$4 sm:$0x33] (!%p148_p9)  }
  0x10   : > { %151 = sbr.rel (%p148_p9) target bundleno = 354 (0x162), region = 28  ;;  %812 = vmatprep.subr.bf16.mxu0 (!%p148_p9), %v902_v0  ;;  %p175_p10 = scmp.lt.s32.totalorder (!%p148_p9), %s752_s28, 63  ;;  %850 = vmatprep.subr.bf16.mxu1 (!%p148_p9), %v902_v0  ;;  %vm362_vm0 = vcmask (!%p148_p9), 1041408   ;;  %vm313_vm1 = vcmask (!%p148_p9), 293888  }
  0x11   : > { %813 = vmatpush3.bf16.msra.mxu0 (!%p148_p9), %v902_v0  ;;  %853 = vmatpush3.bf16.msra.mxu1 (!%p148_p9), %v902_v0  ;;  %v364_v3 = vsel (!%p148_p9), %vm362_vm0, %v904_v2, 0  ;;  %s1165_s8 = sand.u32 (!%p148_p9), 1, %s1007_s13   ;;  %s789_s9 = sshll.u32 (!%p148_p9), %s1060_s16, 4 }
  0x12   : > { %814 = vmatprep.subr.bf16.mxu0 (!%p148_p9), %v903_v1  ;;  %851 = vmatprep.subr.bf16.mxu1 (!%p148_p9), %v903_v1  ;;  %s167_s10 = scalar_lea.vmem (!%p148_p9), [#allocation2], %s1165_s8  ;;  %s173_s17 = scalar_lea.vmem (!%p148_p9), [#allocation4], %s1165_s8 }
  0x13   : > { %s652_s11 = sshll.u32 (!%p148_p9), %s167_s10, 4  ;;  %s665_s19 = sshll.u32 (!%p148_p9), %s173_s17, 4  ;;  %s1177_s11 = int_to_ptr.vmem [resolvable:$true] %s652_s11  ;;  %s1184_s19 = int_to_ptr.vmem [resolvable:$true] %s665_s19 }
  0x14   : > { %s1175_s25 = scalar_lea.hbm (!%p148_p9), %s1251_s2, %s789_s9  ;;  %s1182_s27 = scalar_lea.hbm (!%p148_p9), %s1252_s3, %s789_s9 }
  0x15   : > { %815 = vmatpush3.bf16.msra.mxu0 (!%p148_p9), %v903_v1  ;;  %854 = vmatpush3.bf16.msra.mxu1 (!%p148_p9), %v903_v1  ;;  %s921_s29 = scalar_lea.vmem (!%p148_p9), %s1177_s11, 16  ;;  %s1017_s30 = smov (!%p148_p9), [#allocation2]  }
  0x16   : > { %856 = vmatprep.subr.msk.bf16.mxu0 (!%p148_p9), %vm362_vm0, %v904_v2  ;;  %857 = vmatprep.subr.msk.bf16.mxu1 (!%p148_p9), %vm362_vm0, %v904_v2  ;;  %p922_p11 = scmp.ne.s32.totalorder (!%p148_p9), %s1177_s11, %s921_s29 }
  0x17   : > { %s1260_s28 = smov (!%p175_p10, %s752_s28), 63 }
  0x18   : > { %s753_s4 = sshll.u32 %s1260_s28, 2  ;;  %s636_s28 = scalar_lea.sflag [#allocation3], %s1165_s8 }
  0x19   : > { %s1100_s7 = scalar_lea.vmem %s1249_s0, %s753_s4  ;;  %817 = vmatpush3.bf16.msra.mxu0 %v364_v3  ;;  %855 = vmatpush3.bf16.msra.mxu1 %v364_v3  ;;  %p923_p12 = pnand %p922_p11, %p1077_p5 }
  0x1a   : > { %v905_v4 = vld [vmem:[%s1100_s7] sm:$0xff]   ;;  %v906_v5 = vld [vmem:[%s1100_s7 + $0x8] sm:$0xff]   ;;  %v907_v6 = vld [vmem:[%s1100_s7 + $0x10] sm:$0xff]   ;;  %s925_s4 = sshll.u32 %s1017_s30, 4  ;;  %s926_s4 = int_to_ptr.vmem [resolvable:$false] %s925_s4 }
  0x1b   : > { %818 = vmatprep.mubr.msk.bf16.mxu0 %vm313_vm1, %v905_v4  ;;  %v908_v7 = vld [vmem:[%s1100_s7 + $0x18] sm:$0xff]   ;;  %v913_v8 = vld [vmem:[%s1100_s7 + $0x40] sm:$0xff]   ;;  %v914_v9 = vld [vmem:[%s1100_s7 + $0x48] sm:$0xff]   ;;  %p924_p13 = pneg %p923_p12  ;;  %s927_s5 = scalar_lea.vmem %s926_s4, 32 }
  0x1c   : > { %819 = vmatmul.mubr.msk.bf16.vlgmr.msra.gmra.mrb[0].mxu0 %vm313_vm1, %v906_v5  ;;  %834 = vmatprep.mubr.msk.bf16.mxu1 %vm313_vm1, %v913_v8  ;;  %v915_v10 = vld [vmem:[%s1100_s7 + $0x50] sm:$0xff]   ;;  %v909_v11 = vld [vmem:[%s1100_s7 + $0x20] sm:$0xff]   ;;  %v916_v12 = vld [vmem:[%s1100_s7 + $0x58] sm:$0xff]   ;;  %p928_p0 = scmp.lt.s32.totalorder %s1177_s11, %s926_s4  ;;  %p929_p1 = scmp.lt.s32.totalorder %s927_s5, %s921_s29 }
  0x1d   : > { %822 = vmatprep.mubr.msk.bf16.mxu0 %vm313_vm1, %v907_v6  ;;  %835 = vmatmul.mubr.msk.bf16.vlgmr.msra.gmra.mrb[0].mxu1 %vm313_vm1, %v914_v9  ;;  %v917_v13 = vld [vmem:[%s1100_s7 + $0x60] sm:$0xff]   ;;  %v910_v14 = vld [vmem:[%s1100_s7 + $0x28] sm:$0xff]   ;;  %v911_v15 = vld [vmem:[%s1100_s7 + $0x30] sm:$0xff]  }
  0x1e   : > { %838 = vmatprep.mubr.msk.bf16.mxu1 %vm313_vm1, %v915_v10  ;;  %v918_v16 = vld [vmem:[%s1100_s7 + $0x68] sm:$0xff]   ;;  %v919_v17 = vld [vmem:[%s1100_s7 + $0x70] sm:$0xff]   ;;  %v912_v18 = vld [vmem:[%s1100_s7 + $0x38] sm:$0xff]   ;;  %p930_p2 = por %p929_p1, %p928_p0 }
  0x1f   : > { %v920_v19 = vld [vmem:[%s1100_s7 + $0x78] sm:$0xff]  }
  0x20   : > { %p931_p3 = pnand %p930_p2, %p924_p13 }
  0x24   : > { %823 = vmatmul.mubr.msk.bf16.gmra.mrb[4].mxu0 %vm313_vm1, %v908_v7 }
  0x25   : > { %826 = vmatprep.mubr.msk.bf16.mxu0 %vm313_vm1, %v909_v11  ;;  %839 = vmatmul.mubr.msk.bf16.gmra.mrb[4].mxu1 %vm313_vm1, %v916_v12 }
  0x26   : > { %842 = vmatprep.mubr.msk.bf16.mxu1 %vm313_vm1, %v917_v13 }
  0x2c   : > { %827 = vmatmul.mubr.msk.bf16.gmra.mrb[8].mxu0 %vm313_vm1, %v910_v14 }
  0x2d   : > { %830 = vmatprep.mubr.msk.bf16.mxu0 %vm313_vm1, %v911_v15  ;;  %843 = vmatmul.mubr.msk.bf16.gmra.mrb[8].mxu1 %vm313_vm1, %v918_v16 }
  0x2e   : > { %846 = vmatprep.mubr.msk.bf16.mxu1 %vm313_vm1, %v919_v17 }
  0x34   : > { %831 = vmatmul.mubr.msk.bf16.gmra.mrb[12].mxu0 %vm313_vm1, %v912_v18 }
  0x35   : > { %847 = vmatmul.mubr.msk.bf16.gmra.mrb[12].mxu1 %vm313_vm1, %v920_v19 }
  0xef   : > { %v820_v20 = vpop.f32.mrb[0].mxu0 }
  0xf0   : > { %v400_v21 = vpop.f32.mrb[1].mxu0  ;;  %v1134_v27 = vpop.f32.mrb[0].mxu1  ;;  %v567_v28 = vmul.f32 %v820_v20, %v820_v20 }
  0xf1   : > { %v821_v22 = vpop.f32.mrb[2].mxu0  ;;  %v565_v24 = vmul.f32 %v400_v21, %v400_v21  ;;  %v1136_v31 = vpop.f32.mrb[1].mxu1 }
  0xf2   : > { %v403_v23 = vpop.f32.mrb[3].mxu0  ;;  %v1138_v32 = vpop.f32.mrb[2].mxu1  ;;  %v568_v33 = vmul.f32 %v821_v22, %v821_v22 }
  0xf3   : > { %v527_v25 = vadd.f32 %v403_v23, %v400_v21  ;;  %v566_v26 = vmul.f32 %v403_v23, %v403_v23  ;;  %v1140_v37 = vpop.f32.mrb[3].mxu1 }
  0xf5   : > { %v528_v29 = vadd.f32 %v820_v20, %v527_v25  ;;  %v597_v30 = vadd.f32 %v566_v26, %v565_v24 }
  0xf7   : > { %v598_v34 = vadd.f32 %v597_v30, %v567_v28  ;;  %v824_v35 = vpop.f32.mrb[4].mxu0  ;;  %v529_v36 = vadd.f32 %v821_v22, %v528_v29 }
  0xf8   : > { %v416_v38 = vpop.f32.mrb[5].mxu0  ;;  %v1142_v47 = vpop.f32.mrb[4].mxu1  ;;  %v571_v48 = vmul.f32 %v824_v35, %v824_v35 }
  0xf9   : > { %v530_v39 = vadd.f32 %v529_v36, %v416_v38  ;;  %v569_v40 = vmul.f32 %v416_v38, %v416_v38  ;;  %v599_v41 = vadd.f32 %v598_v34, %v568_v33  ;;  %v825_v42 = vpop.f32.mrb[6].mxu0  ;;  %v480_v51 = vpop.f32.mrb[5].mxu1 }
  0xfa   : > { %v419_v43 = vpop.f32.mrb[7].mxu0  ;;  %v1144_v52 = vpop.f32.mrb[6].mxu1  ;;  %v572_v53 = vmul.f32 %v825_v42, %v825_v42 }
  0xfb   : > { %v600_v44 = vadd.f32 %v599_v41, %v569_v40  ;;  %v531_v45 = vadd.f32 %v530_v39, %v419_v43  ;;  %v570_v46 = vmul.f32 %v419_v43, %v419_v43  ;;  %v483_v57 = vpop.f32.mrb[7].mxu1  ;;  %v583_v43 = vmul.f32 %v1134_v27, %v1134_v27 }
  0xfd   : > { %v532_v49 = vadd.f32 %v824_v35, %v531_v45  ;;  %v601_v50 = vadd.f32 %v600_v44, %v570_v46  ;;  %v581_v35 = vmul.f32 %v1136_v31, %v1136_v31  ;;  %v584_v46 = vmul.f32 %v1138_v32, %v1138_v32 }
  0xff   : > { %v602_v54 = vadd.f32 %v601_v50, %v571_v48  ;;  %v828_v55 = vpop.f32.mrb[8].mxu0  ;;  %v533_v56 = vadd.f32 %v825_v42, %v532_v49  ;;  %v582_v42 = vmul.f32 %v1140_v37, %v1140_v37 }
 0x100   : > { %v432_v58 = vpop.f32.mrb[9].mxu0  ;;  %v844_v3 = vpop.f32.mrb[8].mxu1  ;;  %v575_v4 = vmul.f32 %v828_v55, %v828_v55 }
 0x101   : > { %v534_v59 = vadd.f32 %v533_v56, %v432_v58  ;;  %v573_v60 = vmul.f32 %v432_v58, %v432_v58  ;;  %v603_v61 = vadd.f32 %v602_v54, %v572_v53  ;;  %v829_v62 = vpop.f32.mrb[10].mxu0  ;;  %v496_v7 = vpop.f32.mrb[9].mxu1  ;;  %v586_v56 = vmul.f32 %v483_v57, %v483_v57 }
 0x102   : > { %v435_v63 = vpop.f32.mrb[11].mxu0  ;;  %v845_v8 = vpop.f32.mrb[10].mxu1  ;;  %v576_v9 = vmul.f32 %v829_v62, %v829_v62 }
 0x103   : > { %v604_v0 = vadd.f32 %v603_v61, %v573_v60  ;;  %v535_v1 = vadd.f32 %v534_v59, %v435_v63  ;;  %v574_v2 = vmul.f32 %v435_v63, %v435_v63  ;;  %v499_v13 = vpop.f32.mrb[11].mxu1 }
 0x105   : > { %v536_v5 = vadd.f32 %v828_v55, %v535_v1  ;;  %v605_v6 = vadd.f32 %v604_v0, %v574_v2  ;;  %v590_v1 = vmul.f32 %v499_v13, %v499_v13  ;;  %v591_v2 = vmul.f32 %v844_v3, %v844_v3 }
 0x107   : > { %v606_v10 = vadd.f32 %v605_v6, %v575_v4  ;;  %v832_v11 = vpop.f32.mrb[12].mxu0  ;;  %v537_v12 = vadd.f32 %v829_v62, %v536_v5  ;;  %v589_v62 = vmul.f32 %v496_v7, %v496_v7  ;;  %v592_v5 = vmul.f32 %v845_v8, %v845_v8 }
 0x108   : > { %v448_v14 = vpop.f32.mrb[13].mxu0  ;;  %v848_v23 = vpop.f32.mrb[12].mxu1  ;;  %v579_v24 = vmul.f32 %v832_v11, %v832_v11 }
 0x109   : > { %v538_v15 = vadd.f32 %v537_v12, %v448_v14  ;;  %v577_v16 = vmul.f32 %v448_v14, %v448_v14  ;;  %v607_v17 = vadd.f32 %v606_v10, %v576_v9  ;;  %v833_v18 = vpop.f32.mrb[14].mxu0  ;;  %v512_v28 = vpop.f32.mrb[13].mxu1 }
 0x10a   : > { %v451_v19 = vpop.f32.mrb[15].mxu0  ;;  %v849_v29 = vpop.f32.mrb[14].mxu1  ;;  %v580_v30 = vmul.f32 %v833_v18, %v833_v18  ;;  %v593_v9 = vmul.f32 %v512_v28, %v512_v28 }
 0x10b   : > { %v608_v20 = vadd.f32 %v607_v17, %v577_v16  ;;  %v539_v21 = vadd.f32 %v538_v15, %v451_v19  ;;  %v578_v22 = vmul.f32 %v451_v19, %v451_v19  ;;  %v515_v36 = vpop.f32.mrb[15].mxu1  ;;  %v596_v17 = vmul.f32 %v849_v29, %v849_v29 }
 0x10c   : > { %v594_v15 = vmul.f32 %v515_v36, %v515_v36 }
 0x10d   : > { %v540_v25 = vadd.f32 %v832_v11, %v539_v21  ;;  %v609_v26 = vadd.f32 %v608_v20, %v578_v22 }
 0x10f   : > { %v610_v33 = vadd.f32 %v609_v26, %v579_v24  ;;  %v541_v34 = vadd.f32 %v833_v18, %v540_v25 }
 0x111   : > { %v542_v38 = vadd.f32 %v541_v34, %v1136_v31  ;;  %v611_v39 = vadd.f32 %v610_v33, %v580_v30  ;;  %v585_v31 = vmul.f32 %v480_v51, %v480_v51 }
 0x113   : > { %v612_v40 = vadd.f32 %v611_v39, %v581_v35  ;;  %v543_v41 = vadd.f32 %v542_v38, %v1140_v37  ;;  %v587_v37 = vmul.f32 %v1142_v47, %v1142_v47 }
 0x115   : > { %v544_v44 = vadd.f32 %v1134_v27, %v543_v41  ;;  %v613_v45 = vadd.f32 %v612_v40, %v582_v42  ;;  %v588_v27 = vmul.f32 %v1144_v52, %v1144_v52 }
 0x117   : > { %v614_v48 = vadd.f32 %v613_v45, %v583_v43  ;;  %v545_v49 = vadd.f32 %v1138_v32, %v544_v44 }
 0x119   : > { %v546_v50 = vadd.f32 %v545_v49, %v480_v51  ;;  %v615_v53 = vadd.f32 %v614_v48, %v584_v46 }
 0x11b   : > { %v616_v54 = vadd.f32 %v615_v53, %v585_v31  ;;  %v547_v55 = vadd.f32 %v546_v50, %v483_v57 }
 0x11d   : > { %v548_v58 = vadd.f32 %v1142_v47, %v547_v55  ;;  %v617_v59 = vadd.f32 %v616_v54, %v586_v56 }
 0x11f   : > { %v618_v60 = vadd.f32 %v617_v59, %v587_v37  ;;  %v549_v61 = vadd.f32 %v1144_v52, %v548_v58  ;;  %v595_v52 = vmul.f32 %v848_v23, %v848_v23 }
 0x121   : > { %v550_v32 = vadd.f32 %v549_v61, %v496_v7  ;;  %v619_v63 = vadd.f32 %v618_v60, %v588_v27 }
 0x123   : > { %v620_v51 = vadd.f32 %v619_v63, %v589_v62  ;;  %v551_v0 = vadd.f32 %v550_v32, %v499_v13 }
 0x125   : > { %v552_v57 = vadd.f32 %v844_v3, %v551_v0  ;;  %v621_v4 = vadd.f32 %v620_v51, %v590_v1 }
 0x127   : > { %v622_v6 = vadd.f32 %v621_v4, %v591_v2  ;;  %v553_v47 = vadd.f32 %v845_v8, %v552_v57 }
 0x129   : > { %v554_v10 = vadd.f32 %v553_v47, %v512_v28  ;;  %v623_v11 = vadd.f32 %v622_v6, %v592_v5 }
 0x12b   : > { %v624_v12 = vadd.f32 %v623_v11, %v593_v9  ;;  %v555_v14 = vadd.f32 %v554_v10, %v515_v36 }
 0x12d   : > { %v556_v7 = vadd.f32 %v848_v23, %v555_v14  ;;  %v625_v16 = vadd.f32 %v624_v12, %v594_v15 }
 0x12f   : > { %v557_v18 = vadd.f32 %v849_v29, %v556_v7  ;;  %v626_v13 = vadd.f32 %v625_v16, %v595_v52 }
 0x131   : > { %v558_v19 = vrot.slane %v557_v18, 4  ;;  %v627_v3 = vadd.f32 %v626_v13, %v596_v17 }
 0x133   : > { %v559_v8 = vadd.f32 %v558_v19, %v557_v18  ;;  %v628_v20 = vrot.slane %v627_v3, 4 }
 0x135   : > { %v560_v21 = vrot.slane %v559_v8, 2  ;;  %v629_v22 = vadd.f32 %v628_v20, %v627_v3 }
 0x137   : > { %v561_v24 = vadd.f32 %v560_v21, %v559_v8  ;;  %v630_v25 = vrot.slane %v629_v22, 2 }
 0x139   : > { %v562_v23 = vrot.slane %v561_v24, 1  ;;  %v631_v26 = vadd.f32 %v630_v25, %v629_v22 }
 0x13b   : > { %v563_v28 = vadd.f32 %v562_v23, %v561_v24  ;;  %v632_v29 = vrot.slane %v631_v26, 1 }
 0x13d   : > { %564 = vst [vmem:[%s167_s10] sm:$0x1] %v563_v28  ;;  %v633_v30 = vadd.f32 %v632_v29, %v631_v26 }
 0x13e   : > { %934 = shalt.err (!%p931_p3)
}
 0x13f   : > { %s935_s6 = scalar_lea.hbm %s1175_s25, 16  ;;  %s939_s10 = scalar_lea.hbm %s1251_s2, 32 }
 0x140   : > { %p936_p4 = scmp.ne.s32.totalorder %s1175_s25, %s935_s6  ;;  %p940_p9 = scmp.lt.u32.totalorder %s1175_s25, %s1251_s2 }
 0x141   : > { %p941_p10 = scmp.lt.u32.totalorder %s939_s10, %s935_s6  ;;  %p943_p12 = scmp.lt.u32.totalorder %s935_s6, %s1175_s25 }
 0x142   : > { %p937_p7 = pnand %p936_p4, %p1077_p5 }
 0x143   : > { %p942_p11 = por %p941_p10, %p940_p9 }
 0x144   : > { %p938_p8 = pneg %p937_p7 }
 0x145   : > { %p944_p13 = por %p943_p12, %p942_p11 }
 0x147   : > { %p945_p0 = pnand %p944_p13, %p938_p8 }
 0x149   : > { %948 = shalt.err (!%p945_p0)
}
 0x14a   : > { %858 = dma.vmem_to_hbm [thread:$0]  (%p1077_p5), %s1177_s11, 16, %s1175_s25, %s636_s28   ;;  %634 = vst [vmem:[%s173_s17] sm:$0x1] %v633_v30 }
 0x14b   : > { %s640_s16 = scalar_lea.sflag [#allocation5], %s1165_s8  ;;  %s949_s26 = scalar_lea.vmem %s1184_s19, 16 }
 0x14c   : > { %p950_p1 = scmp.ne.s32.totalorder %s1184_s19, %s949_s26  ;;  %s1018_s29 = smov [#allocation4]  }
 0x14d   : > { %s953_s30 = sshll.u32 %s1018_s29, 4  ;;  %s954_s30 = int_to_ptr.vmem [resolvable:$false] %s953_s30 }
 0x14e   : > { %p951_p2 = pnand %p950_p1, %p1077_p5  ;;  %s955_s4 = scalar_lea.vmem %s954_s30, 32 }
 0x14f   : > { %p956_p4 = scmp.lt.s32.totalorder %s1184_s19, %s954_s30  ;;  %p957_p7 = scmp.lt.s32.totalorder %s955_s4, %s949_s26 }
 0x150   : > { %p952_p3 = pneg %p951_p2 }
 0x151   : > { %p958_p8 = por %p957_p7, %p956_p4 }
 0x153   : > { %p959_p9 = pnand %p958_p8, %p952_p3 }
 0x155   : > { %962 = shalt.err (!%p959_p9)
}
 0x156   : > { %s963_s8 = scalar_lea.hbm %s1182_s27, 16  ;;  %s967_s25 = scalar_lea.hbm %s1252_s3, 32 }
 0x157   : > { %p964_p10 = scmp.ne.s32.totalorder %s1182_s27, %s963_s8  ;;  %p968_p13 = scmp.lt.u32.totalorder %s1182_s27, %s1252_s3 }
 0x158   : > { %p969_p0 = scmp.lt.u32.totalorder %s967_s25, %s963_s8  ;;  %p971_p2 = scmp.lt.u32.totalorder %s963_s8, %s1182_s27 }
 0x159   : > { %p965_p11 = pnand %p964_p10, %p1077_p5 }
 0x15a   : > { %p970_p1 = por %p969_p0, %p968_p13 }
 0x15b   : > { %p966_p12 = pneg %p965_p11 }
 0x15c   : > { %p972_p3 = por %p971_p2, %p970_p1 }
 0x15e   : > { %p973_p4 = pnand %p972_p3, %p966_p12 }
 0x160   : > { %976 = shalt.err (!%p973_p4)
}
 0x161   : > { %859 = dma.vmem_to_hbm [thread:$0]  (%p1077_p5), %s1184_s19, 16, %s1182_s27, %s640_s16  }
 0x162 PF: > { %p869_p7 = scmp.ge.s32.totalorder %s1015_s15, 2  ;;  %s677_s6 = sand.u32 1, %s1003_s12  }
 0x163   : > { %s678_s7 = scalar_lea.sflag [#allocation3], %s677_s6 }
 0x164   : > { %p863_p8 = pnand %p869_p7, %p1081_p6 }
 0x166   : > { %994 = dma.done.wait (!%p863_p8), %s678_s7, 16  }
 0x167   : > { %996 = vsyncadd (!%p863_p8), %s678_s7, 4294967280  ;;  %s686_s9 = scalar_lea.sflag [#allocation5], %s677_s6 }
 0x168   : > { %998 = dma.done.wait (!%p863_p8), %s686_s9, 16  }
 0x169   : > { %1000 = vsyncadd (!%p863_p8), %s686_s9, 4294967280  ;;  %p17_p5 = scmp.ge.s32.totalorder %s1064_s18, 4   ;;  %s1255_s12 = smov %s1007_s13 }
 0x16a   : > { %s1256_s13 = smov %s1011_s14  ;;  %s1257_s14 = smov %s1075_s21 }
 0x16b   : > { %s1258_s15 = smov %s1064_s18  ;;  %19 = sbr.rel (!%p17_p5) target bundleno = 5 (0x5), region = 80 }
 0x172   :  { %690 = vsyncpa [#allocation3], 1 }
 0x173   :  { %692 = vsyncpa [#allocation3 + $0x1], 1 }
 0x174   :  { %693 = vsyncpa [#allocation5], 1 }
 0x175   :  { %695 = vsyncpa [#allocation5 + $0x1], 1 }

</bundles_post_ra>
